<compile_context>
chip_gen: v6e
topology: v6e:2x2x1
jax: 0.10.0
libtpu: 0.0.40
codegen_flags: <defaults>
</compile_context>

<pallas_src>
import functools
import math

import numpy as np
import jax
import jax.numpy as jnp
from jax.experimental import pallas as pl
from jax.experimental.pallas import tpu as pltpu


# --------------------------------------------------------------------------
# Color-space constants (identical to LabtoRGB.__init__), baked as immediates.
#   lab_to_loglms = [[1,1,1],[1,1,-1],[1,-2,0]] @ diag(1/sqrt3,1/sqrt6,1/sqrt2)
_K3 = 1.0 / math.sqrt(3.0)
_K6 = 1.0 / math.sqrt(6.0)
_K2 = 1.0 / math.sqrt(2.0)
_LMS_TO_RGB = (
    (4.4679, -3.5873, 0.1193),
    (-1.2186, 2.3809, -0.1624),
    (0.0497, -0.2439, 1.2045),
)

_CHUNK_ROWS = 64  # rows of 128 lanes per vreg-resident chunk (~8 vregs/channel)


def _cdiv(a, b):
    return -(-a // b)


def _round_up(a, b):
    return _cdiv(a, b) * b


def _lab_to_rgb_kernel(x_ref, o_ref, *, chunk):
    """Block: (TB, 3, EXT[, 128]).

    Works for both layouts:
      * aligned: (TB, 3, TILE_R, 128) -- EXT = rows,   chunk in rows
      * ragged : (TB, 3, TILE_P)      -- EXT = pixels, chunk in pixels
    Processing is chunked along axis 2 so the lms intermediates stay in vregs.
    """
    ext = x_ref.shape[2]
    n_full, tail = divmod(ext, chunk)
    m2 = _LMS_TO_RGB

    def mix(start, size):
        sl = pl.ds(start, size)
        l_ = x_ref[:, 0, sl]
        a_ = x_ref[:, 1, sl]
        b_ = x_ref[:, 2, sl]
        # stage 1: Lab -> logLMS -> LMS (structured 3x3, exp on the EUP)
        s = l_ + a_
        lms0 = jnp.exp((s + b_) * _K3)
        lms1 = jnp.exp((s - (b_ + b_)) * _K6)
        lms2 = jnp.exp((l_ - a_) * _K2)
        # stage 2: LMS -> RGB (3x3 mix with baked immediates, VPU only)
        o_ref[:, 0, sl] = lms0 * m2[0][0] + lms1 * m2[1][0] + lms2 * m2[2][0]
        o_ref[:, 1, sl] = lms0 * m2[0][1] + lms1 * m2[1][1] + lms2 * m2[2][1]
        o_ref[:, 2, sl] = lms0 * m2[0][2] + lms1 * m2[1][2] + lms2 * m2[2][2]

    if n_full > 0:
        @pl.loop(0, n_full)
        def _(i):
            mix(pl.multiple_of(i * chunk, chunk), chunk)
    if tail:
        mix(n_full * chunk, tail)


def _plan_tiles(B, R, max_rows, min_steps):
    """Pick (tb, tile_r, nr).  tile_r is a multiple of 8 or equals R."""
    # 1) at most max_rows rows per block, balanced across blocks.
    nr = max(1, _cdiv(R, max_rows))
    # 2) guarantee a few grid steps (DMA/compute overlap, both v7x TCs):
    #    batch steps come free; otherwise split rows (multiples of 8).
    if B * nr < min_steps and R >= 16:
        nr = min(max(nr, _cdiv(min_steps, B)), _cdiv(R, 8))
    if nr > 1:
        tile_r = _round_up(_cdiv(R, nr), 8)   # balanced -> no empty tail step
        nr = _cdiv(R, tile_r)
    else:
        tile_r = R
    # 3) pack several small images per block while keeping >= min_steps steps.
    tb = 1
    if nr == 1 and B > 1:
        tb = max(1, min(B, max_rows // max(tile_r, 1), max(1, B // min_steps)))
    return tb, tile_r, nr


def lab_to_rgb(x, *, max_rows_per_block=4096, min_steps=4):
    """Lab -> RGB.  x: (B, 3, H, W) -> (B, 3, H, W), same dtype."""
    B, C, H, W = x.shape
    if C != 3:
        raise ValueError("LabtoRGB expects 3 channels")
    P = H * W
    aligned = (P % 128 == 0)
    R = P // 128 if aligned else _cdiv(P, 128)

    tb, tile_r, nr = _plan_tiles(B, R, max_rows_per_block, min_steps)

    if aligned:
        # Lane-dense (rows, 128) slabs: full vreg occupancy, unmasked stores.
        x_in = x.reshape(B, C, R, 128)                  # free bitcast
        block = (tb, C, tile_r, 128)
        index_map = lambda b, r: (b, 0, r, 0)
        chunk = _CHUNK_ROWS
        out_struct = jax.ShapeDtypeStruct((B, C, R, 128), x.dtype)
    else:
        # Ragged H*W: keep the tensor flat; the last pixel block is partial and
        # Pallas masks its writeback -> no pad/slice HBM round trips.
        x_in = x.reshape(B, C, P)                       # free bitcast
        block = (tb, C, tile_r * 128)
        index_map = lambda b, r: (b, 0, r)
        chunk = _CHUNK_ROWS * 128
        out_struct = jax.ShapeDtypeStruct((B, C, P), x.dtype)

    grid = (_cdiv(B, tb), nr)

    out = pl.pallas_call(
        functools.partial(_lab_to_rgb_kernel, chunk=chunk),
        out_shape=out_struct,
        grid_spec=pltpu.PrefetchScalarGridSpec(
            num_scalar_prefetch=0,
            grid=grid,
            in_specs=[pl.BlockSpec(block, index_map)],
            out_specs=pl.BlockSpec(block, index_map),
        ),
        compiler_params=pltpu.CompilerParams(
            dimension_semantics=("parallel", "parallel"),
            # in+out double-buffered at 4096x128x3 f32 rows is ~24 MiB; 48 MiB
            # leaves headroom and stays under v7x's 64 MiB physical VMEM.
            vmem_limit_bytes=48 * 1024 * 1024,
        ),
        cost_estimate=pl.CostEstimate(
            flops=23 * B * P,
            transcendentals=3 * B * P,
            bytes_accessed=2 * B * C * P * x.dtype.itemsize,
        ),
    )(x_in)

    return out.reshape(B, C, H, W)


def _reference(x):
    """Pure-JAX reference matching the PyTorch module."""
    scale = np.diag([1.0 / math.sqrt(3.0), 1.0 / math.sqrt(6.0),
                     1.0 / math.sqrt(2.0)]).astype(np.float32)
    m1 = np.array([[1.0, 1.0, 1.0], [1.0, 1.0, -1.0], [1.0, -2.0, 0.0]],
                  dtype=np.float32) @ scale
    m2 = np.array(_LMS_TO_RGB, dtype=np.float32)
    hi = jax.lax.Precision.HIGHEST
    loglms = jnp.einsum("bchw,cd->bdhw", x, m1, precision=hi)
    return jnp.einsum("bchw,cd->bdhw", jnp.exp(loglms), m2, precision=hi)


if __name__ == "__main__":
    key = jax.random.PRNGKey(0)
    k1, k2, k3, k4 = jax.random.split(key, 4)

    # 1) Small, lane-aligned input (P % 128 == 0), in-kernel tail-only path.
    x1 = jax.random.uniform(k1, (2, 3, 16, 16), jnp.float32, -0.5, 0.5)
    o1 = jax.block_until_ready(lab_to_rgb(x1))
    assert o1.shape == x1.shape and o1.dtype == x1.dtype
    assert jnp.allclose(o1, _reference(x1), atol=1e-5, rtol=1e-5)

    # 2) Ragged H*W (13*17 = 221): flat path, partial last block, no pad/slice.
    x2 = jax.random.uniform(k2, (1, 3, 13, 17), jnp.float32, -0.5, 0.5)
    o2 = jax.block_until_ready(lab_to_rgb(x2))
    assert jnp.allclose(o2, _reference(x2), atol=1e-5, rtol=1e-5)

    # 3) Aligned, big enough for min-step row splitting + in-kernel chunk loop.
    x3 = jax.random.uniform(k3, (2, 3, 64, 512), jnp.float32, -0.5, 0.5)
    o3 = jax.block_until_ready(lab_to_rgb(x3))
    assert jnp.allclose(o3, _reference(x3), atol=1e-5, rtol=1e-5)

    # 4) Aligned with a ragged trailing row-block (R not a multiple of tile_r),
    #    forced via a small max_rows_per_block (exercises partial row blocks).
    x4 = jax.random.uniform(k4, (1, 3, 40, 128), jnp.float32, -0.5, 0.5)
    o4 = jax.block_until_ready(lab_to_rgb(x4, max_rows_per_block=24))
    assert jnp.allclose(o4, _reference(x4), atol=1e-5, rtol=1e-5)

    print("KERNEL_OK")
</pallas_src>

<mosaic_0001>
module attributes {stable_mosaic.version = 11 : i64} {
  func.func @_lab_to_rgb_kernel(%arg0: i32, %arg1: i32, %arg2: memref<1x3x2x128xf32, #tpu.memory_space<vmem>>, %arg3: memref<1x3x2x128xf32, #tpu.memory_space<vmem>>) attributes {dimension_semantics = [#tpu.dimension_semantics<parallel>, #tpu.dimension_semantics<parallel>], iteration_bounds = array<i64: 2, 1>, scalar_prefetch = 0 : i64, scratch_operands = 0 : i64, tpu.core_type = #tpu.core_type<tc>, window_params = [{transform_indices = @transform_0, window_bounds = array<i64: 1, 3, 2, 128>}, {transform_indices = @transform_1, window_bounds = array<i64: 1, 3, 2, 128>}]} {
    %c0 = arith.constant 0 : index
    %c0_0 = arith.constant 0 : index
    %c0_1 = arith.constant 0 : index
    %c0_2 = arith.constant 0 : index
    %0 = vector.load %arg2[%c0, %c0_0, %c0_1, %c0_2] : memref<1x3x2x128xf32, #tpu.memory_space<vmem>>, vector<1x1x2x128xf32>
    %1 = vector.shape_cast %0 : vector<1x1x2x128xf32> to vector<1x2x128xf32>
    %c0_3 = arith.constant 0 : index
    %c1 = arith.constant 1 : index
    %c0_4 = arith.constant 0 : index
    %c0_5 = arith.constant 0 : index
    %2 = vector.load %arg2[%c0_3, %c1, %c0_4, %c0_5] : memref<1x3x2x128xf32, #tpu.memory_space<vmem>>, vector<1x1x2x128xf32>
    %3 = vector.shape_cast %2 : vector<1x1x2x128xf32> to vector<1x2x128xf32>
    %c0_6 = arith.constant 0 : index
    %c2 = arith.constant 2 : index
    %c0_7 = arith.constant 0 : index
    %c0_8 = arith.constant 0 : index
    %4 = vector.load %arg2[%c0_6, %c2, %c0_7, %c0_8] : memref<1x3x2x128xf32, #tpu.memory_space<vmem>>, vector<1x1x2x128xf32>
    %5 = vector.shape_cast %4 : vector<1x1x2x128xf32> to vector<1x2x128xf32>
    %6 = arith.addf %1, %3 : vector<1x2x128xf32>
    %7 = arith.addf %6, %5 : vector<1x2x128xf32>
    %cst = arith.constant 0.577350259 : f32
    %8 = vector.broadcast %cst : f32 to vector<1x2x128xf32>
    %9 = arith.mulf %7, %8 : vector<1x2x128xf32>
    %10 = math.exp %9 : vector<1x2x128xf32>
    %11 = arith.addf %5, %5 : vector<1x2x128xf32>
    %12 = arith.subf %6, %11 : vector<1x2x128xf32>
    %cst_9 = arith.constant 0.408248305 : f32
    %13 = vector.broadcast %cst_9 : f32 to vector<1x2x128xf32>
    %14 = arith.mulf %12, %13 : vector<1x2x128xf32>
    %15 = math.exp %14 : vector<1x2x128xf32>
    %16 = arith.subf %1, %3 : vector<1x2x128xf32>
    %cst_10 = arith.constant 0.707106769 : f32
    %17 = vector.broadcast %cst_10 : f32 to vector<1x2x128xf32>
    %18 = arith.mulf %16, %17 : vector<1x2x128xf32>
    %19 = math.exp %18 : vector<1x2x128xf32>
    %cst_11 = arith.constant 4.467900e+00 : f32
    %20 = vector.broadcast %cst_11 : f32 to vector<1x2x128xf32>
    %21 = arith.mulf %10, %20 : vector<1x2x128xf32>
    %cst_12 = arith.constant -1.218600e+00 : f32
    %22 = vector.broadcast %cst_12 : f32 to vector<1x2x128xf32>
    %23 = arith.mulf %15, %22 : vector<1x2x128xf32>
    %24 = arith.addf %21, %23 : vector<1x2x128xf32>
    %cst_13 = arith.constant 4.970000e-02 : f32
    %25 = vector.broadcast %cst_13 : f32 to vector<1x2x128xf32>
    %26 = arith.mulf %19, %25 : vector<1x2x128xf32>
    %27 = arith.addf %24, %26 : vector<1x2x128xf32>
    %c0_14 = arith.constant 0 : index
    %c0_15 = arith.constant 0 : index
    %c0_16 = arith.constant 0 : index
    %c0_17 = arith.constant 0 : index
    %28 = vector.load %arg3[%c0_14, %c0_15, %c0_16, %c0_17] : memref<1x3x2x128xf32, #tpu.memory_space<vmem>>, vector<1x1x2x128xf32>
    %29 = vector.shape_cast %28 : vector<1x1x2x128xf32> to vector<1x2x128xf32>
    %30 = vector.shape_cast %27 : vector<1x2x128xf32> to vector<1x1x2x128xf32>
    tpu.vector_store %arg3[%c0_14, %c0_15, %c0_16, %c0_17], %30 {strides = array<i32>} : memref<1x3x2x128xf32, #tpu.memory_space<vmem>>, vector<1x1x2x128xf32>,
    %cst_18 = arith.constant -3.587300e+00 : f32
    %31 = vector.broadcast %cst_18 : f32 to vector<1x2x128xf32>
    %32 = arith.mulf %10, %31 : vector<1x2x128xf32>
    %cst_19 = arith.constant 2.380900e+00 : f32
    %33 = vector.broadcast %cst_19 : f32 to vector<1x2x128xf32>
    %34 = arith.mulf %15, %33 : vector<1x2x128xf32>
    %35 = arith.addf %32, %34 : vector<1x2x128xf32>
    %cst_20 = arith.constant -2.439000e-01 : f32
    %36 = vector.broadcast %cst_20 : f32 to vector<1x2x128xf32>
    %37 = arith.mulf %19, %36 : vector<1x2x128xf32>
    %38 = arith.addf %35, %37 : vector<1x2x128xf32>
    %c0_21 = arith.constant 0 : index
    %c1_22 = arith.constant 1 : index
    %c0_23 = arith.constant 0 : index
    %c0_24 = arith.constant 0 : index
    %39 = vector.load %arg3[%c0_21, %c1_22, %c0_23, %c0_24] : memref<1x3x2x128xf32, #tpu.memory_space<vmem>>, vector<1x1x2x128xf32>
    %40 = vector.shape_cast %39 : vector<1x1x2x128xf32> to vector<1x2x128xf32>
    %41 = vector.shape_cast %38 : vector<1x2x128xf32> to vector<1x1x2x128xf32>
    tpu.vector_store %arg3[%c0_21, %c1_22, %c0_23, %c0_24], %41 {strides = array<i32>} : memref<1x3x2x128xf32, #tpu.memory_space<vmem>>, vector<1x1x2x128xf32>,
    %cst_25 = arith.constant 1.193000e-01 : f32
    %42 = vector.broadcast %cst_25 : f32 to vector<1x2x128xf32>
    %43 = arith.mulf %10, %42 : vector<1x2x128xf32>
    %cst_26 = arith.constant -1.624000e-01 : f32
    %44 = vector.broadcast %cst_26 : f32 to vector<1x2x128xf32>
    %45 = arith.mulf %15, %44 : vector<1x2x128xf32>
    %46 = arith.addf %43, %45 : vector<1x2x128xf32>
    %cst_27 = arith.constant 1.204500e+00 : f32
    %47 = vector.broadcast %cst_27 : f32 to vector<1x2x128xf32>
    %48 = arith.mulf %19, %47 : vector<1x2x128xf32>
    %49 = arith.addf %46, %48 : vector<1x2x128xf32>
    %c0_28 = arith.constant 0 : index
    %c2_29 = arith.constant 2 : index
    %c0_30 = arith.constant 0 : index
    %c0_31 = arith.constant 0 : index
    %50 = vector.load %arg3[%c0_28, %c2_29, %c0_30, %c0_31] : memref<1x3x2x128xf32, #tpu.memory_space<vmem>>, vector<1x1x2x128xf32>
    %51 = vector.shape_cast %50 : vector<1x1x2x128xf32> to vector<1x2x128xf32>
    %52 = vector.shape_cast %49 : vector<1x2x128xf32> to vector<1x1x2x128xf32>
    tpu.vector_store %arg3[%c0_28, %c2_29, %c0_30, %c0_31], %52 {strides = array<i32>} : memref<1x3x2x128xf32, #tpu.memory_space<vmem>>, vector<1x1x2x128xf32>,
    return
  }
  func.func @transform_0(%arg0: i32, %arg1: i32) -> (i32, i32, i32, i32) {
    %c0_i32 = arith.constant 0 : i32
    %c0_i32_0 = arith.constant 0 : i32
    %c0_i32_1 = arith.constant 0 : i32
    return %arg0, %c0_i32, %arg1, %c0_i32_0 : i32, i32, i32, i32
  }
  func.func @transform_1(%arg0: i32, %arg1: i32) -> (i32, i32, i32, i32) {
    %c0_i32 = arith.constant 0 : i32
    %c0_i32_0 = arith.constant 0 : i32
    %c0_i32_1 = arith.constant 0 : i32
    return %arg0, %c0_i32, %arg1, %c0_i32_0 : i32, i32, i32, i32
  }
}

</mosaic_0001>

<bundles_post_ra>
// kernel: tpu_custom_call.1
= control target key start
LH: loop header
LB: loop body
LE: loop exit
PB: predicated region body
PF: predicated region fallthrough
CT: control target
= control target key end

     0   :  { %6 = vsyncpa [#allocation3], 0  ;;  %s652_s0 = inlined_call_operand.hbm [shape: f32[2,3,2,128], index: 0, kind: input, shape index: {}]   ;;  %s653_s1 = inlined_call_operand.hbm [shape: f32[2,3,2,128], index: 1, kind: output, shape index: {}]  }
   0x1   :  { %8 = vsyncpa [#allocation3 + $0x1], 0 }
   0x2   :  { %9 = vsyncpa [#allocation4], 0 }
   0x3   :  { %11 = vsyncpa [#allocation4 + $0x1], 0  ;;  %s506_s6 = smov 0   ;;  %s508_s7 = smov 0  }
   0x4   :  { %s510_s8 = smov 0   ;;  %s512_s9 = smov 0  }
   0x5   :  { %s514_s10 = smov 0   ;;  %s516_s11 = smov 0  }
   0x6 LB: > { %s291_s12 = sadd.s32 4294967295, %s488_s11   ;;  %s292_s13 = sadd.s32 4294967294, %s488_s11   ;;  %s488_s11 = sphi %s516_s11, %s17_s11   ;;  %s484_s10 = sphi %s514_s10, %s664_s10   ;;  %s480_s9 = sphi %s512_s9, %s663_s9   ;;  %s476_s8 = sphi %s510_s8, %s662_s8   ;;  %s472_s7 = sphi %s508_s7, %s661_s7   ;;  %s468_s6 = sphi %s506_s6, %s660_s6  }
   0x7   : > { %s29_s14 = sadd.s32 1, %s484_s10  ;;  %s38_s15 = sadd.s32 1, %s476_s8 }
   0x8   : > { %p31_p0 = scmp.ge.s32.totalorder %s29_s14, 2  ;;  %p45_p1 = scmp.ne.s32.totalorder %s476_s8, %s472_s7 }
   0x9   : > { %p46_p2 = scmp.eq.s32.totalorder %s488_s11, 0  ;;  %p51_p3 = scmp.ne.s32.totalorder %s472_s7, %s468_s6 }
   0xa   : > { %s666_s14 = smov (%p31_p0, %s29_s14), 0  ;;  %p52_p5 = scmp.eq.s32.totalorder %s291_s12, 0 }
   0xb   : > { %p547_p4 = por %p46_p2, %p45_p1  ;;  %s33_s17 = ssub.s32 %s484_s10, %s666_s14 }
   0xc   : > { %p77_p6 = scmp.eq.s32.totalorder %s291_s12, 1  ;;  %p36_p7 = scmp.eq.s32.totalorder %s33_s17, 0 }
   0xd   : > { %p553_p8 = por %p52_p5, %p51_p3  ;;  %p83_p10 = scmp.eq.s32.totalorder %s292_s13, 1 }
   0xe   : > { %p557_p9 = por %p77_p6, %p45_p1  ;;  %p320_p13 = scmp.lt.s32.totalorder %s488_s11, 2 }
   0xf   : > { %s562_s20 = scalar_select %p36_p7, %s476_s8, %s38_s15  }
  0x10   : > { %p564_p11 = por %p83_p10, %p51_p3  ;;  %s103_s22 = sand.u32 1, %s476_s8  }
  0x11   : > { %s304_s23 = smul.u32 6, %s103_s22  ;;  %p574_p0 = pnand %p320_p13, %p547_p4 }
  0x12   : > { %s305_s24 = smul.u32 96, %s484_s10  ;;  %p296_p1 = scmp.ge.s32.totalorder %s488_s11, 1 }
  0x13   : > { %s107_s29 = scalar_lea.vmem [#allocation2], %s304_s23  ;;  %s104_s2 = scalar_lea.sflag [#allocation3], %s103_s22 }
  0x14   : > { %s114_s28 = scalar_lea.hbm %s652_s0, %s305_s24  ;;  %s115_s30 = sshll.u32 %s107_s29, 4  ;;  %s116_s30 = int_to_ptr.vmem [resolvable:$true] %s115_s30 }
  0x15   : > { %p382_p2 = pneg %p574_p0  ;;  %s393_s3 = scalar_lea.vmem %s116_s30, 96 }
  0x16   : > { %p394_p3 = scmp.ne.s32.totalorder %s116_s30, %s393_s3  ;;  %s490_s4 = smov [#allocation2]  }
  0x17   : > { %s398_s5 = sshll.u32 %s490_s4, 4  ;;  %s399_s5 = int_to_ptr.vmem [resolvable:$false] %s398_s5 }
  0x18   : > { %p396_p5 = pnand %p394_p3, %p382_p2  ;;  %s400_s12 = scalar_lea.vmem %s399_s5, 192 }
  0x19   : > { %p401_p4 = scmp.lt.s32.totalorder %s116_s30, %s399_s5  ;;  %p402_p7 = scmp.lt.s32.totalorder %s400_s12, %s393_s3 }
  0x1a   : > { %p397_p6 = pneg %p396_p5 }
  0x1b   : > { %p403_p10 = por %p402_p7, %p401_p4 }
  0x1d   : > { %p404_p13 = pnand %p403_p10, %p397_p6 }
  0x1f   : > { %407 = shalt.err (!%p404_p13)
}
  0x20   : > { %s491_s13 = smov 32   ;;  %s492_s15 = smov 2  }
  0x21   : > { %315 = dma.hbm_to_vmem [thread:$0]  (!%p574_p0), %s114_s28, 96, %s116_s30, %s104_s2, %s491_s13, %s491_s13, %s492_s15  }
  0x22   : > { %p123_p12 = scmp.lt.s32.totalorder %s488_s11, 3 }
  0x24   : > { %p124_p2 = pnand %p296_p1, %p123_p12 }
  0x25   : > { %s590_s16 = sand.u32 (!%p124_p2), 1, %s472_s7  }
  0x26   : > { %127 = sbr.rel (%p124_p2) target bundleno = 89 (0x59), region = 24  ;;  %s130_s22 = scalar_lea.sflag (!%p124_p2), [#allocation3], %s590_s16 }
  0x27   : > { %s306_s17 = smul.u32 (!%p124_p2), 6, %s590_s16 }
  0x29   : > { %s133_s23 = scalar_lea.vmem (!%p124_p2), [#allocation2], %s306_s17 }
  0x2b   : > { %459 = dma.done.wait (%p553_p8), %s130_s22, 96  }
  0x2c   : > { %461 = vsyncadd (%p553_p8), %s130_s22, 4294967200  ;;  %v152_v0 = vld [vmem:[%s133_s23] sm:$0x3]  ;;  %v297_v1 = vld [vmem:[%s133_s23 + $0x2] sm:$0x3]  ;;  %s151_s18 = scalar_lea.vmem [#allocation5], %s306_s17 }
  0x2d   : > { %v298_v2 = vld [vmem:[%s133_s23 + $0x4] sm:$0x3]  ;;  %v157_v3 = vadd.f32 %v297_v1, %v152_v0  ;;  %v167_v5 = vsub.f32 %v152_v0, %v297_v1  ;;  %s206_s24 = sshll.u32 %s151_s18, 4  ;;  %s307_s25 = smul.u32 96, %s480_s9  ;;  %s599_s24 = int_to_ptr.vmem [resolvable:$true] %s206_s24 }
  0x2e   : > { %v162_v4 = vadd.f32 %v298_v2, %v298_v2  ;;  %s192_s28 = scalar_lea.sflag [#allocation4], %s590_s16  ;;  %s408_s29 = scalar_lea.vmem %s599_s24, 96 }
  0x2f   : > { %v158_v6 = vadd.f32 %v298_v2, %v157_v3  ;;  %v168_v8 = vmul.f32 0.70710677, %v167_v5  ;;  %s604_s27 = scalar_lea.hbm %s653_s1, %s307_s25  ;;  %p409_p8 = scmp.ne.s32.totalorder %s599_s24, %s408_s29 }
  0x30   : > { %v163_v7 = vsub.f32 %v157_v3, %v162_v4  ;;  %s493_s30 = smov [#allocation5]  }
  0x31   : > { %v159_v9 = vmul.f32 0.57735026, %v158_v6  ;;  %v169_v11 = vmul.f32 1.442695, %v168_v8  ;;  %p410_p12 = pnand %p409_p8, %p557_p9  ;;  %s412_s2 = sshll.u32 %s493_s30, 4  ;;  %s413_s2 = int_to_ptr.vmem [resolvable:$false] %s412_s2 }
  0x32   : > { %v164_v10 = vmul.f32 0.4082483, %v163_v7  ;;  %s414_s3 = scalar_lea.vmem %s413_s2, 192  ;;  %p415_p1 = scmp.lt.s32.totalorder %s599_s24, %s413_s2 }
  0x33   : > { %v160_v12 = vmul.f32 1.442695, %v159_v9  ;;  %374 = vpow2.f32 %v169_v11  ;;  %p411_p0 = pneg %p410_p12  ;;  %p416_p3 = scmp.lt.s32.totalorder %s414_s3, %s408_s29 }
  0x34   : > { %v165_v13 = vmul.f32 1.442695, %v164_v10 }
  0x35   : > { %376 = vpow2.f32 %v160_v12  ;;  %p417_p5 = por %p416_p3, %p415_p1 }
  0x36   : > { %378 = vpow2.f32 %v165_v13 }
  0x37   : > { %p418_p6 = pnand %p417_p5, %p411_p0 }
  0x40   : > { %v375_v14 = vpop.eup %374 }
  0x41   : > { %v174_v16 = vmul.f32 0.0497, %v375_v14  ;;  %v180_v17 = vmul.f32 -0.2439, %v375_v14  ;;  %v187_v18 = vmul.f32 1.2045, %v375_v14 }
  0x42   : > { %v377_v15 = vpop.eup %376 }
  0x43   : > { %v379_v19 = vpop.eup %378  ;;  %v171_v20 = vmul.f32 4.4679, %v377_v15  ;;  %v177_v21 = vmul.f32 -3.5873, %v377_v15  ;;  %v184_v22 = vmul.f32 0.1193, %v377_v15 }
  0x44   : > { %v172_v23 = vmul.f32 -1.2186, %v379_v19  ;;  %v178_v24 = vmul.f32 2.3809, %v379_v19  ;;  %v185_v25 = vmul.f32 -0.1624, %v379_v19 }
  0x46   : > { %v173_v26 = vadd.f32 %v172_v23, %v171_v20  ;;  %v179_v27 = vadd.f32 %v178_v24, %v177_v21  ;;  %v186_v28 = vadd.f32 %v185_v25, %v184_v22 }
  0x48   : > { %v175_v29 = vadd.f32 %v174_v16, %v173_v26  ;;  %v181_v30 = vadd.f32 %v180_v17, %v179_v27  ;;  %v188_v31 = vadd.f32 %v187_v18, %v186_v28 }
  0x4a   : > { %176 = vst [vmem:[%s151_s18] sm:$0x3] %v175_v29  ;;  %299 = vst [vmem:[%s151_s18 + $0x2] sm:$0x3] %v181_v30 }
  0x4b   : > { %300 = vst [vmem:[%s151_s18 + $0x4] sm:$0x3] %v188_v31 }
  0x4c   : > { %421 = shalt.err (!%p418_p6)
}
  0x4d   : > { %s422_s4 = scalar_lea.hbm %s604_s27, 96  ;;  %s426_s13 = scalar_lea.hbm %s653_s1, 192 }
  0x4e   : > { %p423_p4 = scmp.ne.s32.totalorder %s604_s27, %s422_s4  ;;  %p427_p13 = scmp.lt.s32.totalorder %s604_s27, %s653_s1 }
  0x4f   : > { %p428_p2 = scmp.lt.s32.totalorder %s426_s13, %s422_s4 }
  0x50   : > { %p424_p7 = pnand %p423_p4, %p557_p9 }
  0x51   : > { %p429_p8 = por %p428_p2, %p427_p13 }
  0x52   : > { %p425_p10 = pneg %p424_p7 }
  0x54   : > { %p430_p12 = pnand %p429_p8, %p425_p10 }
  0x56   : > { %433 = shalt.err (!%p430_p12)
}
  0x57   : > { %s494_s22 = smov 32   ;;  %s495_s23 = smov 2  }
  0x58   : > { %310 = dma.vmem_to_hbm [thread:$0]  (%p557_p9), %s599_s24, 96, %s604_s27, %s192_s28, %s494_s22, %s494_s22, %s495_s23  }
  0x59 PF: > { %s221_s18 = sand.u32 1, %s468_s6   ;;  %p659_p0 = scmp.ge.s32.totalorder %s488_s11, 2 }
  0x5a   : > { %s222_s25 = scalar_lea.sflag [#allocation4], %s221_s18 }
  0x5b   : > { %p317_p1 = pnand %p659_p0, %p564_p11 }
  0x5d   : > { %p318_p3 = pneg %p317_p1 }
  0x5f   : > { %463 = dma.done.wait (%p318_p3), %s222_s25, 96  }
  0x60   : > { %465 = vsyncadd (%p318_p3), %s222_s25, 4294967200  ;;  %s17_s11 = sadd.s32 1, %s488_s11   ;;  %s660_s6 = smov %s472_s7 }
  0x61   : > { %p14_p5 = scmp.ge.s32.totalorder %s17_s11, 4   ;;  %s661_s7 = smov %s476_s8 }
  0x62   : > { %s662_s8 = smov %s562_s20  ;;  %s663_s9 = smov %s484_s10 }
  0x63   : > { %s664_s10 = smov %s666_s14  ;;  %16 = sbr.rel (!%p14_p5) target bundleno = 6 (0x6), region = 73 }
  0x68   :  { %227 = vsyncpa [#allocation3], 1 }
  0x69   :  { %229 = vsyncpa [#allocation3 + $0x1], 1 }
  0x6a   :  { %230 = vsyncpa [#allocation4], 1 }
  0x6b   :  { %232 = vsyncpa [#allocation4 + $0x1], 1 }

</bundles_post_ra>
